<compile_context>
chip_gen: v5e
topology: v5e:2x2
jax: 0.10.0
libtpu: 0.0.40
codegen_flags: <defaults>
</compile_context>

<pallas_src>
import jax
import jax.numpy as jnp
from jax.experimental import pallas as pl
from jax.experimental.pallas import tpu as pltpu


def _affine_kernel(x_ref, alpha_ref, beta_ref, o_ref):
    # x_ref: (TD, TN) or (TR, TN); alpha_ref/beta_ref: (TD, 1)/(TR, 1) in f32.
    # Lane-broadcast FMA on the VPU in f32; cast only at the store.
    o_ref[...] = (x_ref[...] * alpha_ref[...] + beta_ref[...]).astype(o_ref.dtype)


def _pick_tile(extent: int, target: int, align: int) -> int:
    """Largest legal tile <= target.

    If the whole axis fits in the target, use the full extent (always a legal block_shape).
    Otherwise use the target rounded down to `align` so the block satisfies the (8, 128)
    divisibility rule; ragged edge blocks are handled by Pallas grid masking.
    """
    if extent <= target:
        return extent
    return max((target // align) * align, align)


def _vmem_limit_bytes() -> int:
    """~75% of physical VMEM: 96 MiB on v5e/v6e (128 MiB), 48 MiB on v7x (64 MiB)."""
    try:
        cap = pltpu.get_tpu_info().vmem_capacity_bytes
        return min((cap * 3) // 4, 96 << 20)
    except Exception:
        return 48 << 20  # safe on every generation


def affine(x, alpha, beta, *, td_target: int = 256, tn_target: int = 4096):
    """x: (B, dim, N); alpha, beta: (1, dim, 1). Returns x * alpha + beta (in x.dtype)."""
    B, D, N = x.shape
    assert alpha.shape == (1, D, 1) and beta.shape == (1, D, 1)

    # Keep parameters in f32 inside the kernel (precision for bf16 x; free when mem-bound).
    alpha32 = alpha.astype(jnp.float32)
    beta32 = beta.astype(jnp.float32)

    # dtype-aware sublane alignment: f32 -> 8, bf16 -> 16, int8/fp8 -> 32.
    itemsize = jnp.dtype(x.dtype).itemsize
    sub_align = max(8, (8 * 4) // max(1, itemsize))

    vmem_limit = _vmem_limit_bytes()
    TN = _pick_tile(N, tn_target, 128)

    if D < sub_align:
        # Small-channel path: collapse (B, D) rows to restore full sublane occupancy.
        R = B * D
        x2 = x.reshape(R, N)                                   # contiguous, free
        a2 = jnp.broadcast_to(alpha32, (B, D, 1)).reshape(R, 1)
        b2 = jnp.broadcast_to(beta32, (B, D, 1)).reshape(R, 1)
        TR = _pick_tile(R, td_target, sub_align)
        grid = (pl.cdiv(R, TR), pl.cdiv(N, TN))
        out2 = pl.pallas_call(
            _affine_kernel,
            out_shape=jax.ShapeDtypeStruct((R, N), x.dtype),
            grid=grid,
            in_specs=[
                pl.BlockSpec((TR, TN), lambda r, n: (r, n)),
                pl.BlockSpec((TR, 1), lambda r, n: (r, 0)),
                pl.BlockSpec((TR, 1), lambda r, n: (r, 0)),
            ],
            out_specs=pl.BlockSpec((TR, TN), lambda r, n: (r, n)),
            compiler_params=pltpu.CompilerParams(
                dimension_semantics=("parallel", "parallel"),
                vmem_limit_bytes=vmem_limit,
            ),
        )(x2, a2, b2)
        return out2.reshape(B, D, N)

    # General path: 3-D grid (B, D-tiles, N-tiles); batch dim squeezed out of the kernel view.
    TD = _pick_tile(D, td_target, sub_align)
    grid = (B, pl.cdiv(D, TD), pl.cdiv(N, TN))
    return pl.pallas_call(
        _affine_kernel,
        out_shape=jax.ShapeDtypeStruct((B, D, N), x.dtype),
        grid=grid,
        in_specs=[
            pl.BlockSpec((pl.Squeezed(), TD, TN), lambda b, d, n: (b, d, n)),
            pl.BlockSpec((pl.Squeezed(), TD, 1), lambda b, d, n: (0, d, 0)),
            pl.BlockSpec((pl.Squeezed(), TD, 1), lambda b, d, n: (0, d, 0)),
        ],
        out_specs=pl.BlockSpec((pl.Squeezed(), TD, TN), lambda b, d, n: (b, d, n)),
        compiler_params=pltpu.CompilerParams(
            dimension_semantics=("parallel", "parallel", "parallel"),
            vmem_limit_bytes=vmem_limit,
        ),
    )(x, alpha32, beta32)


if __name__ == "__main__":
    key = jax.random.PRNGKey(0)
    kx, ka, kb = jax.random.split(key, 3)

    # Small (batch, channels, seq) shape matching the module; exercises the row-collapse path.
    B, dim, N = 2, 4, 16
    x = jax.random.normal(kx, (B, dim, N), dtype=jnp.float32)
    alpha = jax.random.normal(ka, (1, dim, 1), dtype=jnp.float32)
    beta = jax.random.normal(kb, (1, dim, 1), dtype=jnp.float32)

    out = jax.block_until_ready(affine(x, alpha, beta))
    ref = x * alpha + beta
    assert out.shape == ref.shape and out.dtype == ref.dtype
    assert jnp.allclose(out, ref, atol=1e-6, rtol=1e-6)

    # Tiled 3-D path with Squeezed batch dim and ragged D/N edges.
    B2, D2, N2 = 2, 24, 4096 + 256
    x2 = jax.random.normal(kx, (B2, D2, N2), dtype=jnp.float32)
    a2 = jax.random.normal(ka, (1, D2, 1), dtype=jnp.float32)
    b2 = jax.random.normal(kb, (1, D2, 1), dtype=jnp.float32)
    out2 = jax.block_until_ready(affine(x2, a2, b2, td_target=16, tn_target=2048))
    assert jnp.allclose(out2, x2 * a2 + b2, atol=1e-6, rtol=1e-6)

    # bf16 activations with f32 parameters (f32 FMA inside the kernel, cast only at store).
    B3, D3, N3 = 1, 64, 256
    x3 = jax.random.normal(kx, (B3, D3, N3), dtype=jnp.bfloat16)
    a3 = jax.random.normal(ka, (1, D3, 1), dtype=jnp.float32)
    b3 = jax.random.normal(kb, (1, D3, 1), dtype=jnp.float32)
    out3 = jax.block_until_ready(affine(x3, a3, b3))
    ref3 = (x3.astype(jnp.float32) * a3 + b3).astype(jnp.bfloat16)
    assert out3.dtype == jnp.bfloat16
    assert jnp.allclose(out3.astype(jnp.float32), ref3.astype(jnp.float32), atol=1e-2, rtol=1e-2)

    print("KERNEL_OK")
</pallas_src>

<mosaic_0001>
module attributes {stable_mosaic.version = 11 : i64} {
  func.func @_affine_kernel(%arg0: i32, %arg1: i32, %arg2: memref<8x16xf32, #tpu.memory_space<vmem>>, %arg3: memref<8x1xf32, #tpu.memory_space<vmem>>, %arg4: memref<8x1xf32, #tpu.memory_space<vmem>>, %arg5: memref<8x16xf32, #tpu.memory_space<vmem>>) attributes {dimension_semantics = [#tpu.dimension_semantics<parallel>, #tpu.dimension_semantics<parallel>], iteration_bounds = array<i64: 1, 1>, scalar_prefetch = 0 : i64, scratch_operands = 0 : i64, tpu.core_type = #tpu.core_type<tc>, window_params = [{transform_indices = @transform_0, window_bounds = array<i64: 8, 16>}, {transform_indices = @transform_1, window_bounds = array<i64: 8, 1>}, {transform_indices = @transform_2, window_bounds = array<i64: 8, 1>}, {transform_indices = @transform_3, window_bounds = array<i64: 8, 16>}]} {
    %c0 = arith.constant 0 : index
    %c0_0 = arith.constant 0 : index
    %0 = vector.load %arg2[%c0, %c0_0] : memref<8x16xf32, #tpu.memory_space<vmem>>, vector<8x16xf32>
    %c0_1 = arith.constant 0 : index
    %c0_2 = arith.constant 0 : index
    %1 = vector.load %arg3[%c0_1, %c0_2] : memref<8x1xf32, #tpu.memory_space<vmem>>, vector<8x1xf32>
    %2 = vector.broadcast %1 : vector<8x1xf32> to vector<8x16xf32>
    %3 = arith.mulf %0, %2 : vector<8x16xf32>
    %c0_3 = arith.constant 0 : index
    %c0_4 = arith.constant 0 : index
    %4 = vector.load %arg4[%c0_3, %c0_4] : memref<8x1xf32, #tpu.memory_space<vmem>>, vector<8x1xf32>
    %5 = vector.broadcast %4 : vector<8x1xf32> to vector<8x16xf32>
    %6 = arith.addf %3, %5 : vector<8x16xf32>
    %c0_5 = arith.constant 0 : index
    %c0_6 = arith.constant 0 : index
    %7 = vector.load %arg5[%c0_5, %c0_6] : memref<8x16xf32, #tpu.memory_space<vmem>>, vector<8x16xf32>
    tpu.vector_store %arg5[%c0_5, %c0_6], %6 {strides = array<i32>} : memref<8x16xf32, #tpu.memory_space<vmem>>, vector<8x16xf32>,
    return
  }
  func.func @transform_0(%arg0: i32, %arg1: i32) -> (i32, i32) {
    %c0_i32 = arith.constant 0 : i32
    return %arg0, %arg1 : i32, i32
  }
  func.func @transform_1(%arg0: i32, %arg1: i32) -> (i32, i32) {
    %c0_i32 = arith.constant 0 : i32
    %c0_i32_0 = arith.constant 0 : i32
    return %arg0, %c0_i32 : i32, i32
  }
  func.func @transform_2(%arg0: i32, %arg1: i32) -> (i32, i32) {
    %c0_i32 = arith.constant 0 : i32
    %c0_i32_0 = arith.constant 0 : i32
    return %arg0, %c0_i32 : i32, i32
  }
  func.func @transform_3(%arg0: i32, %arg1: i32) -> (i32, i32) {
    %c0_i32 = arith.constant 0 : i32
    return %arg0, %arg1 : i32, i32
  }
}

</mosaic_0001>

<bundles_post_ra>
// kernel: tpu_custom_call.1
= control target key start
LH: loop header
LB: loop body
LE: loop exit
PB: predicated region body
PF: predicated region fallthrough
CT: control target
= control target key end

     0   :  { %s111_s0 = inlined_call_operand.vmem [shape: f32[8,16], index: 0, kind: input, shape index: {}]   ;;  %s112_s1 = inlined_call_operand.vmem [shape: f32[8,1], index: 1, kind: input, shape index: {}]   ;;  %s113_s2 = inlined_call_operand.vmem [shape: f32[8,1], index: 2, kind: input, shape index: {}]   ;;  %s114_s3 = inlined_call_operand.hbm [shape: f32[8,16], index: 3, kind: output, shape index: {}]  }
   0x1   :  { %v16_v0 = vld [vmem:[%s112_s1] sm:$0xff] }
   0x2   :  { %8 = vsyncpa [#allocation3], 0  ;;  %v77_v1 = vmov 0   ;;  %v23_v2 = vld [vmem:[%s113_s2] sm:$0xff]  ;;  %s78_s18 = smov [#allocation2]   ;;  %s39_s1 = sshll.u32 %s114_s3, 4  ;;  %s40_s1 = int_to_ptr.hbm [resolvable:$true] %s39_s1 }
   0x3   :  { %50 = vset.pattern.permute.xlu0 %v77_v1  ;;  %v15_v4 = vld [vmem:[%s111_s0] sm:$0xff]  ;;  %s37_s19 = sshll.u32 %s78_s18, 4  ;;  %vm30_vm0 = vcmask 130048   ;;  %s38_s19 = int_to_ptr.vmem [resolvable:$true] %s37_s19 }
   0x4   :  { %19 = vperm.xlu0 %50, %v16_v0  }
   0xc   :  { %26 = vperm.xlu0 %50, %v23_v2  }
  0x76   :  { %v20_v3 = vpop.permute.xlu0 %19 }
  0x77   :  { %v22_v5 = vmul.f32 %v20_v3, %v15_v4 }
  0x7e   :  { %v27_v6 = vpop.permute.xlu0 %26 }
  0x7f   :  { %v29_v7 = vadd.f32 %v27_v6, %v22_v5 }
  0x81   :  { %31 = vst.msk [vmem:[#allocation2] sm:$0xff] %vm30_vm0, %v29_v7 }
  0x82   :  { %42 = dma.vmem_to_hbm [thread:$0]  %s38_s19, 128, %s40_s1, [#allocation3]  }
  0x83   :  { %75 = dma.done.wait [#allocation3], 128  }
  0x84   :  { %76 = vsyncadd [#allocation3], 4294967168 }
  0x85   :  { %47 = vsyncpa [#allocation3], 1 }

</bundles_post_ra>
